<compile_context>
chip_gen: v6e
topology: v6e:2x2x1
jax: 0.10.0
libtpu: 0.0.40
codegen_flags: <defaults>
</compile_context>

<pallas_src>
import jax
import jax.numpy as jnp
from jax.experimental import pallas as pl
from jax.experimental.pallas import tpu as pltpu

LANE = 128  # pad the tag dim of W / bias / accumulator to this inside VMEM


def _round_up(x, m):
    return ((x + m - 1) // m) * m


def _sublane(dtype):
    # Second-to-last block dim must be a multiple of this (32-bit tile = 8 rows).
    return {4: 8, 2: 16, 1: 32}.get(jnp.dtype(dtype).itemsize, 8)


def linear_kernel(x_ref, w_ref, b_ref, o_ref):
    # x_ref: (TM, K)     features tile in native dtype (cast to bf16 here)
    # w_ref: (K, Npad)   transposed + lane-padded weight, resident across grid
    # b_ref: (1, Npad)   f32 bias row (padded)
    # o_ref: (TM, ntags) narrow output tile — only real tag columns hit HBM
    ntags = o_ref.shape[1]
    x = x_ref[...].astype(w_ref.dtype)               # in-kernel cast (VPU, hidden under DMA)
    acc = jnp.dot(x, w_ref[...], preferred_element_type=jnp.float32)
    acc = acc + b_ref[...]
    o_ref[...] = acc[:, :ntags].astype(o_ref.dtype)


def prepare_params(weight, bias, *, param_dtype=jnp.bfloat16):
    """One-time static param prep: transpose + pad tag dim to a lane multiple.

    weight: (num_tags, 768) PyTorch Linear layout; bias: (num_tags,).
    Returns (w_t, b_row, num_tags) with w_t: (768, Npad), b_row: (1, Npad).
    """
    num_tags, k = weight.shape
    n_pad = max(LANE, _round_up(num_tags, LANE))
    w_t = jnp.zeros((k, n_pad), dtype=param_dtype)
    w_t = w_t.at[:, :num_tags].set(weight.T.astype(param_dtype))
    b_row = jnp.zeros((1, n_pad), dtype=jnp.float32)
    b_row = b_row.at[:, :num_tags].set(bias.astype(jnp.float32))
    return w_t, b_row, num_tags


def crf_model2_forward(features, w_t, b_row, num_tags, *,
                       tile_m=2048, min_pallas_rows=1024):
    """features: (B, S, 768). Returns emissions (B, S, num_tags)."""
    B, S, K = features.shape
    M = B * S
    out_dtype = features.dtype
    n_pad = w_t.shape[1]

    # Small-M fallback: single fused XLA matmul beats a 1-step custom call.
    if M < min_pallas_rows:
        x = features.reshape(M, K).astype(w_t.dtype)
        acc = jnp.dot(x, w_t, preferred_element_type=jnp.float32) + b_row
        return acc[:, :num_tags].astype(out_dtype).reshape(B, S, num_tags)

    x = features.reshape(M, K)          # no cast, no pad — native dtype to HBM read

    # Tile rows: big tiles to amortize per-step overhead, but >= 2 grid steps
    # so v7x megacore has one step per TensorCore. Partial last block is fine.
    align = _sublane(features.dtype)
    tile_m_eff = min(tile_m, _round_up(max(1, (M + 1) // 2), align))
    tile_m_eff = max(align, _round_up(tile_m_eff, align))
    grid = (pl.cdiv(M, tile_m_eff),)

    in_itemsize = jnp.dtype(features.dtype).itemsize
    w_itemsize = jnp.dtype(w_t.dtype).itemsize
    out_itemsize = jnp.dtype(out_dtype).itemsize

    # Explicit VMEM budget: double-buffered x tile + resident W/bias + out tile.
    working_set = 2 * (tile_m_eff * K * in_itemsize
                       + K * n_pad * w_itemsize
                       + n_pad * 4
                       + tile_m_eff * num_tags * out_itemsize)
    vmem_limit = min(max(int(working_set * 1.25) + (2 << 20), 16 << 20), 96 << 20)

    bytes_accessed = (
        M * K * in_itemsize                 # real feature read (native dtype)
        + K * n_pad * w_itemsize            # weight read (once)
        + M * num_tags * out_itemsize       # narrow output write
    )

    out = pl.pallas_call(
        linear_kernel,
        out_shape=jax.ShapeDtypeStruct((M, num_tags), out_dtype),
        grid_spec=pltpu.PrefetchScalarGridSpec(
            num_scalar_prefetch=0,
            grid=grid,
            in_specs=[
                pl.BlockSpec((tile_m_eff, K), lambda i: (i, 0)),   # x tile
                pl.BlockSpec((K, n_pad), lambda i: (0, 0)),        # full W^T
                pl.BlockSpec((1, n_pad), lambda i: (0, 0)),        # bias row
            ],
            # last dim == full array dim (num_tags) -> (8,128) rule satisfied.
            out_specs=pl.BlockSpec((tile_m_eff, num_tags), lambda i: (i, 0)),
        ),
        compiler_params=pltpu.CompilerParams(
            dimension_semantics=("parallel",),
            vmem_limit_bytes=vmem_limit,
        ),
        cost_estimate=pl.CostEstimate(
            flops=2 * M * K * n_pad,        # actual MXU work (padded N)
            transcendentals=0,
            bytes_accessed=bytes_accessed,
        ),
    )(x, w_t, b_row)

    return out.reshape(B, S, num_tags)


if __name__ == "__main__":
    # Small shapes consistent with the module: hidden must be 768.
    B, S, HIDDEN, NUM_TAGS = 2, 8, 768, 8

    key = jax.random.PRNGKey(0)
    k_x, k_w, k_b, k_x2 = jax.random.split(key, 4)

    features = jax.random.normal(k_x, (B, S, HIDDEN), dtype=jnp.float32)

    # Deterministic synthetic params mimicking nn.Linear(768, num_tags) init
    # (uniform in +/- 1/sqrt(768)); no checkpoint loading.
    bound = 1.0 / jnp.sqrt(jnp.float32(HIDDEN))
    weight = jax.random.uniform(
        k_w, (NUM_TAGS, HIDDEN), dtype=jnp.float32, minval=-bound, maxval=bound
    )
    bias = jax.random.uniform(
        k_b, (NUM_TAGS,), dtype=jnp.float32, minval=-bound, maxval=bound
    )

    # One-time param prep (static across forward calls).
    w_t, b_row, num_tags = prepare_params(weight, bias)

    # --- Pallas path (force it even though M=16 < fallback threshold) ---
    emissions = crf_model2_forward(features, w_t, b_row, num_tags,
                                   min_pallas_rows=0)
    emissions = jax.block_until_ready(emissions)
    assert emissions.shape == (B, S, NUM_TAGS)

    # Reference 1: bf16-rounded params/activations, f32 math.
    f_bf = features.astype(jnp.bfloat16).astype(jnp.float32)
    w_bf = weight.astype(jnp.bfloat16).astype(jnp.float32)
    ref_bf16 = f_bf @ w_bf.T + bias
    assert jnp.allclose(emissions, ref_bf16, atol=1e-2, rtol=1e-2)

    # Reference 2: full-f32 PyTorch-equivalent math (loose tol for bf16 compute).
    ref_f32 = features @ weight.T + bias
    assert jnp.allclose(emissions, ref_f32, atol=5e-2, rtol=5e-2)

    # --- Partial-last-block path (M not a multiple of the tile) ---
    B2, S2 = 3, 7  # M = 21 -> tile 16, grid 2, last block partial
    features2 = jax.random.normal(k_x2, (B2, S2, HIDDEN), dtype=jnp.float32)
    emissions2 = crf_model2_forward(features2, w_t, b_row, num_tags,
                                    min_pallas_rows=0)
    emissions2 = jax.block_until_ready(emissions2)
    assert emissions2.shape == (B2, S2, NUM_TAGS)
    ref2 = features2 @ weight.T + bias
    assert jnp.allclose(emissions2, ref2, atol=5e-2, rtol=5e-2)

    # --- Small-M fallback path (default threshold) matches the kernel ---
    emissions_fb = crf_model2_forward(features, w_t, b_row, num_tags)
    emissions_fb = jax.block_until_ready(emissions_fb)
    assert jnp.allclose(emissions, emissions_fb, atol=1e-2, rtol=1e-2)

    # TODO(synk): CRF log-likelihood / Viterbi decode (compute_loss, decode)
    # are not part of forward() and are left unimplemented.
    print("KERNEL_OK")
</pallas_src>

<mosaic_0001>
module attributes {stable_mosaic.version = 11 : i64} {
  func.func @linear_kernel(%arg0: i32, %arg1: memref<8x768xf32, #tpu.memory_space<vmem>>, %arg2: memref<768x128xbf16, #tpu.memory_space<vmem>>, %arg3: memref<1x128xf32, #tpu.memory_space<vmem>>, %arg4: memref<8x8xf32, #tpu.memory_space<vmem>>) attributes {dimension_semantics = [#tpu.dimension_semantics<parallel>], iteration_bounds = array<i64: 2>, scalar_prefetch = 0 : i64, scratch_operands = 0 : i64, tpu.core_type = #tpu.core_type<tc>, window_params = [{transform_indices = @transform_0, window_bounds = array<i64: 8, 768>}, {pipeline_mode = #tpu.pipeline_mode<synchronous>, transform_indices = @transform_1, window_bounds = array<i64: 768, 128>}, {pipeline_mode = #tpu.pipeline_mode<synchronous>, transform_indices = @transform_2, window_bounds = array<i64: 1, 128>}, {transform_indices = @transform_3, window_bounds = array<i64: 8, 8>}]} {
    %c0 = arith.constant 0 : index
    %c0_0 = arith.constant 0 : index
    %0 = vector.load %arg1[%c0, %c0_0] : memref<8x768xf32, #tpu.memory_space<vmem>>, vector<8x768xf32>
    %1 = arith.truncf %0 : vector<8x768xf32> to vector<8x768xbf16>
    %c0_1 = arith.constant 0 : index
    %c0_2 = arith.constant 0 : index
    %2 = vector.load %arg2[%c0_1, %c0_2] : memref<768x128xbf16, #tpu.memory_space<vmem>>, vector<768x128xbf16>
    %cst = arith.constant dense<0.000000e+00> : vector<8x128xf32>
    %3 = tpu.matmul %1, %2, %cst {dimension_numbers = #tpu.dot_dimension_numbers<[1], [0], [0], [1], [0, 0, 1, 1], [], []>} : vector<8x768xbf16>, vector<768x128xbf16>, vector<8x128xf32> -> vector<8x128xf32>
    %c0_3 = arith.constant 0 : index
    %c0_4 = arith.constant 0 : index
    %4 = vector.load %arg3[%c0_3, %c0_4] : memref<1x128xf32, #tpu.memory_space<vmem>>, vector<1x128xf32>
    %5 = vector.broadcast %4 : vector<1x128xf32> to vector<8x128xf32>
    %6 = arith.addf %3, %5 : vector<8x128xf32>
    %7 = vector.extract_strided_slice %6 {offsets = [0, 0], sizes = [8, 8], strides = [1, 1]} : vector<8x128xf32> to vector<8x8xf32>
    %c0_5 = arith.constant 0 : index
    %c0_6 = arith.constant 0 : index
    %8 = vector.load %arg4[%c0_5, %c0_6] : memref<8x8xf32, #tpu.memory_space<vmem>>, vector<8x8xf32>
    tpu.vector_store %arg4[%c0_5, %c0_6], %7 {strides = array<i32>} : memref<8x8xf32, #tpu.memory_space<vmem>>, vector<8x8xf32>,
    return
  }
  func.func @transform_0(%arg0: i32) -> (i32, i32) {
    %c0_i32 = arith.constant 0 : i32
    %c0_i32_0 = arith.constant 0 : i32
    return %arg0, %c0_i32 : i32, i32
  }
  func.func @transform_1(%arg0: i32) -> (i32, i32) {
    %c0_i32 = arith.constant 0 : i32
    %c0_i32_0 = arith.constant 0 : i32
    %c0_i32_1 = arith.constant 0 : i32
    return %c0_i32, %c0_i32_0 : i32, i32
  }
  func.func @transform_2(%arg0: i32) -> (i32, i32) {
    %c0_i32 = arith.constant 0 : i32
    %c0_i32_0 = arith.constant 0 : i32
    %c0_i32_1 = arith.constant 0 : i32
    return %c0_i32, %c0_i32_0 : i32, i32
  }
  func.func @transform_3(%arg0: i32) -> (i32, i32) {
    %c0_i32 = arith.constant 0 : i32
    %c0_i32_0 = arith.constant 0 : i32
    return %arg0, %c0_i32 : i32, i32
  }
}

</mosaic_0001>

<bundles_post_ra>
// kernel: tpu_custom_call.1
= control target key start
LH: loop header
LB: loop body
LE: loop exit
PB: predicated region body
PF: predicated region fallthrough
CT: control target
= control target key end

     0   :  { %8 = vsyncpa [#allocation3], 0  ;;  %s1277_s0 = inlined_call_operand.hbm [shape: f32[16,768], index: 0, kind: input, shape index: {}]   ;;  %s1278_s1 = inlined_call_operand.hbm [shape: bf16[768,128], index: 1, kind: input, shape index: {}]   ;;  %s1279_s2 = inlined_call_operand.vmem [shape: f32[1,128], index: 2, kind: input, shape index: {}]   ;;  %s1280_s3 = inlined_call_operand.vmem [shape: f32[16,8], index: 3, kind: output, shape index: {}]  }
   0x1   :  { %10 = vsyncpa [#allocation3 + $0x1], 0 }
   0x2   :  { %11 = vsyncpa [#allocation5], 0  ;;  %s1149_s12 = smov 0   ;;  %s1151_s13 = smov 0  }
   0x3   :  { %s1153_s14 = smov 0   ;;  %s1155_s15 = smov 0  }
   0x4 LB: > { %s1168_s16 = sadd.s32 4294967295, %s1123_s15   ;;  %p37_p0 = scmp.ne.s32.totalorder %s1115_s13, %s1111_s12  ;;  %s1123_s15 = sphi %s1155_s15, %s1295_s15   ;;  %s1119_s14 = sphi %s1153_s14, %s1294_s14   ;;  %s1115_s13 = sphi %s1151_s13, %s1293_s13   ;;  %s1111_s12 = sphi %s1149_s12, %s1292_s12  }
   0x5   : > { %p1281_p1 = scmp.eq.s32.totalorder %s1168_s16, 0  ;;  %p804_p2 = scmp.ge.s32.totalorder %s1123_s15, 1 }
   0x6   : > { %p116_p3 = scmp.lt.s32.totalorder %s1123_s15, 3  ;;  %s1125_s19 = smov [#allocation4]  }
   0x7   : > { %p1176_p4 = por %p1281_p1, %p37_p0  ;;  %s128_s20 = sshll.u32 %s1125_s19, 4  ;;  %s129_s20 = int_to_ptr.vmem [resolvable:$true] %s128_s20 }
   0x8   : > { %p1180_p5 = pnand %p804_p2, %p116_p3  ;;  %s1193_s22 = sadd.s32 1, %s1123_s15  }
   0x9   : > { %s1284_s17 = scalar_select %p1176_p4, 1, 0 }
   0xa   : > { %s1285_s18 = scalar_select %p1180_p5, 1, 0 }
   0xb   : > { %p937_p6 = pneg %p1180_p5  ;;  %s24_s23 = sadd.s32 1, %s1119_s14 }
   0xc   : > { %s21_s24 = ssub.s32 %s1123_s15, %s1193_s22  ;;  %s1042_s25 = scalar_lea.vmem %s129_s20, 6144 }
   0xd   : > { %p1188_p7 = pnand %p937_p6, %p1281_p1  ;;  %p1043_p9 = scmp.ne.s32.totalorder %s129_s20, %s1042_s25 }
   0xe   : > { %p1050_p12 = scmp.lt.s32.totalorder %s129_s20, %s129_s20  ;;  %p1051_p13 = scmp.lt.s32.totalorder %s1042_s25, %s1042_s25 }
   0xf   : > { %p1033_p8 = pneg %p1188_p7 }
  0x10   : > { %p1052_p0 = por %p1051_p13, %p1050_p12 }
  0x11   : > { %p1045_p10 = pnand %p1043_p9, %p1033_p8 }
  0x13   : > { %p1046_p11 = pneg %p1045_p10 }
  0x15   : > { %p1053_p2 = pnand %p1052_p0, %p1046_p11 }
  0x17   : > { %1056 = shalt.err (!%p1053_p2)
}
  0x18   : > { %s1126_s26 = smov 64   ;;  %s1127_s27 = smov 4  }
  0x19   : > { %940 = dma.hbm_to_vmem [thread:$0]  (!%p1188_p7), %s1278_s1, 6144, %s129_s20, [#allocation5], %s1126_s26, %s1126_s26, %s1127_s27  }
  0x1a   : > { %p22_p3 = scmp.eq.s32.totalorder %s21_s24, 0  ;;  %p31_p6 = scmp.ne.s32.totalorder %s1119_s14, %s1115_s13 }
  0x1b   : > { %p32_p8 = scmp.eq.s32.totalorder %s1123_s15, 0  ;;  %p946_p9 = scmp.lt.s32.totalorder %s1123_s15, 2 }
  0x1c   : > { %s1210_s30 = scalar_select %p22_p3, %s1119_s14, %s24_s23  }
  0x1d   : > { %p33_p10 = por %p32_p8, %p31_p6  ;;  %s145_s4 = sand.u32 1, %s1119_s14  }
  0x1e   : > { %s928_s5 = smul.u32 48, %s145_s4  ;;  %s146_s19 = scalar_lea.sflag [#allocation3], %s145_s4 }
  0x1f   : > { %s929_s6 = smul.u32 768, %s1123_s15  ;;  %p1214_p11 = pnand %p946_p9, %p33_p10 }
  0x20   : > { %s149_s11 = scalar_lea.vmem [#allocation2], %s928_s5  ;;  %s1062_s23 = scalar_lea.hbm %s1277_s0, 1536 }
  0x21   : > { %s1221_s10 = scalar_lea.hbm %s1277_s0, %s929_s6  ;;  %s157_s12 = sshll.u32 %s149_s11, 4  ;;  %s158_s12 = int_to_ptr.vmem [resolvable:$true] %s157_s12 }
  0x22   : > { %s1057_s20 = scalar_lea.hbm %s1221_s10, 768  ;;  %p1059_p12 = pneg %p1214_p11 }
  0x23   : > { %p1058_p7 = scmp.ne.s32.totalorder %s1221_s10, %s1057_s20  ;;  %p1063_p2 = scmp.lt.s32.totalorder %s1221_s10, %s1277_s0 }
  0x24   : > { %p1064_p3 = scmp.lt.s32.totalorder %s1062_s23, %s1057_s20 }
  0x25   : > { %p1060_p13 = pnand %p1059_p12, %p1058_p7 }
  0x26   : > { %p1065_p6 = por %p1064_p3, %p1063_p2 }
  0x27   : > { %p1061_p0 = pneg %p1060_p13 }
  0x29   : > { %p1066_p8 = pnand %p1065_p6, %p1061_p0 }
  0x2b   : > { %1069 = shalt.err (!%p1066_p8)
}
  0x2c   : > { %s1070_s26 = scalar_lea.vmem %s158_s12, 768  ;;  %s1128_s27 = smov [#allocation2]  }
  0x2d   : > { %p1071_p9 = scmp.ne.s32.totalorder %s158_s12, %s1070_s26  ;;  %s1075_s28 = sshll.u32 %s1128_s27, 4  ;;  %s1076_s28 = int_to_ptr.vmem [resolvable:$false] %s1075_s28 }
  0x2e   : > { %s1077_s29 = scalar_lea.vmem %s1076_s28, 1536  ;;  %p1078_p7 = scmp.lt.s32.totalorder %s158_s12, %s1076_s28 }
  0x2f   : > { %p1073_p10 = pnand %p1071_p9, %p1059_p12  ;;  %p1079_p13 = scmp.lt.s32.totalorder %s1077_s29, %s1070_s26 }
  0x31   : > { %p1074_p1 = pneg %p1073_p10  ;;  %p1080_p4 = por %p1079_p13, %p1078_p7 }
  0x33   : > { %p1081_p5 = pnand %p1080_p4, %p1074_p1 }
  0x35   : > { %1084 = shalt.err (!%p1081_p5)
}
  0x36   : > { %944 = dma.hbm_to_vmem [thread:$0]  (!%p1214_p11), %s1221_s10, 768, %s158_s12, %s146_s19  }
  0x37   : > { %p1288_p0 = scmp.ne.s32.totalorder %s1285_s18, 0 }
  0x38   : > { %s168_s4 = sand.u32 (!%p1288_p0), 1, %s1115_s13   ;;  %p1289_p12 = scmp.ne.s32.totalorder (!%p1288_p0), %s1284_s17, 0 }
  0x39   : > { %166 = sbr.rel (%p1288_p0) target bundleno = 331 (0x14b), region = 32  ;;  %s169_s6 = scalar_lea.sflag (!%p1288_p0), [#allocation3], %s168_s4 }
  0x3a   : > { %s930_s5 = smul.u32 (!%p1288_p0), 48, %s168_s4 }
  0x3c   : > { %s1240_s8 = scalar_lea.vmem (!%p1288_p0), [#allocation2], %s930_s5 }
  0x3e   : > { %1102 = dma.done.wait (%p1289_p12), %s169_s6, 768  }
  0x3f   : > { %1104 = vsyncadd (%p1289_p12), %s169_s6, 4294966528  ;;  %p1290_p1 = scmp.eq.s32.totalorder %s1168_s16, 0 }
  0x41   : > { %1106 = dma.done.wait (%p1290_p1), [#allocation5], 6144   ;;  %p1291_p4 = pmov %p1290_p1 }
  0x42   : > { %v983_v0 = vld [vmem:[#allocation4 + $0x78] sm:$0xff]   ;;  %v987_v4 = vld [vmem:[#allocation4 + $0x70] sm:$0xff]   ;;  %v991_v8 = vld [vmem:[#allocation4 + $0x68] sm:$0xff]   ;;  %p198_p5 = scmp.lt.s32.totalorder %s1168_s16, 1  ;;  %vm726_vm0 = vcmask 64512  }
  0x43   : > { %1108 = vsyncadd (%p1291_p4), [#allocation5], 4294961152  ;;  %v984_v1 = vld [vmem:[#allocation4 + $0x38] sm:$0xff]   ;;  %862 = vmatprep.subr.bf16.mxu0 %v983_v0  ;;  %v988_v5 = vld [vmem:[#allocation4 + $0x30] sm:$0xff]  }
  0x44   : > { %v985_v2 = vld [vmem:[#allocation4 + $0xf8] sm:$0xff]   ;;  %863 = vmatpush3.bf16.msra.mxu0 %v984_v1  ;;  %v989_v6 = vld [vmem:[#allocation4 + $0xf0] sm:$0xff]   ;;  %v992_v9 = vld [vmem:[#allocation4 + $0x28] sm:$0xff]   ;;  %s1297_s16 = smov (!%p198_p5, %s1168_s16), 1 }
  0x45   : > { %v986_v3 = vld [vmem:[#allocation4 + $0xb8] sm:$0xff]   ;;  %884 = vmatprep.subr.bf16.mxu1 %v985_v2  ;;  %864 = vmatprep.subr.bf16.mxu0 %v987_v4  ;;  %v990_v7 = vld [vmem:[#allocation4 + $0xb0] sm:$0xff]   ;;  %v993_v10 = vld [vmem:[#allocation4 + $0xe8] sm:$0xff]   ;;  %s810_s7 = sshll.u32 %s1297_s16, 3 }
  0x46   : > { %885 = vmatpush3.bf16.msra.mxu1 %v986_v3  ;;  %v994_v11 = vld [vmem:[#allocation4 + $0xa8] sm:$0xff]   ;;  %v995_v12 = vld [vmem:[#allocation4 + $0x60] sm:$0xff]   ;;  %v999_v16 = vld [vmem:[#allocation4 + $0x58] sm:$0xff]   ;;  %s201_s11 = scalar_lea.vmem %s1280_s3, %s810_s7 }
  0x47   : > { %886 = vmatprep.subr.bf16.mxu1 %v989_v6  ;;  %v996_v13 = vld [vmem:[#allocation4 + $0x20] sm:$0xff]   ;;  %v1000_v17 = vld [vmem:[#allocation4 + $0x18] sm:$0xff]   ;;  %v1003_v20 = vld [vmem:[#allocation4 + $0x50] sm:$0xff]  }
  0x48   : > { %865 = vmatpush3.bf16.msra.mxu0 %v988_v5  ;;  %v997_v14 = vld [vmem:[#allocation4 + $0xe0] sm:$0xff]   ;;  %v1001_v18 = vld [vmem:[#allocation4 + $0xd8] sm:$0xff]   ;;  %v1004_v21 = vld [vmem:[#allocation4 + $0x10] sm:$0xff]  }
  0x49   : > { %866 = vmatprep.subr.bf16.mxu0 %v991_v8  ;;  %v998_v15 = vld [vmem:[#allocation4 + $0xa0] sm:$0xff]   ;;  %v1002_v19 = vld [vmem:[#allocation4 + $0x98] sm:$0xff]   ;;  %v1005_v22 = vld [vmem:[#allocation4 + $0xd0] sm:$0xff]  }
  0x4a   : > { %887 = vmatpush3.bf16.msra.mxu1 %v990_v7  ;;  %v1006_v23 = vld [vmem:[#allocation4 + $0x90] sm:$0xff]   ;;  %v1007_v24 = vld [vmem:[#allocation4 + $0x48] sm:$0xff]   ;;  %v1011_v28 = vld [vmem:[#allocation4 + $0x40] sm:$0xff]  }
  0x4b   : > { %888 = vmatprep.subr.bf16.mxu1 %v993_v10  ;;  %v1008_v25 = vld [vmem:[#allocation4 + $0x8] sm:$0xff]   ;;  %v1012_v29 = vld [vmem:[#allocation4] sm:$0xff]   ;;  %v1015_v36 = vld [vmem:[#allocation4 + $0x178] sm:$0xff]  }
  0x4c   : > { %867 = vmatpush3.bf16.msra.mxu0 %v992_v9  ;;  %v1009_v26 = vld [vmem:[#allocation4 + $0xc8] sm:$0xff]   ;;  %v1013_v30 = vld [vmem:[#allocation4 + $0xc0] sm:$0xff]   ;;  %v1016_v39 = vld [vmem:[#allocation4 + $0x138] sm:$0xff]  }
  0x4d   : > { %868 = vmatprep.subr.bf16.mxu0 %v995_v12  ;;  %v1010_v27 = vld [vmem:[#allocation4 + $0x88] sm:$0xff]   ;;  %v1014_v33 = vld [vmem:[#allocation4 + $0x80] sm:$0xff]   ;;  %v1017_v42 = vld [vmem:[#allocation4 + $0x170] sm:$0xff]  }
  0x4e   : > { %889 = vmatpush3.bf16.msra.mxu1 %v994_v11  ;;  %v204_v31 = vld [vmem:[%s1240_s8 + $0x8] sm:$0xff]  ;;  %v203_v34 = vld [vmem:[%s1240_s8] sm:$0xff]  ;;  %v206_v37 = vld [vmem:[%s1240_s8 + $0x18] sm:$0xff] }
  0x4f   : > { %890 = vmatprep.subr.bf16.mxu1 %v997_v14  ;;  %v210_v32 = vpack.c.bf16 %v204_v31, %v204_v31  ;;  %v209_v35 = vpack.c.bf16 %v203_v34, %v203_v34  ;;  %v212_v38 = vpack.c.bf16 %v206_v37, %v206_v37  ;;  %v205_v40 = vld [vmem:[%s1240_s8 + $0x10] sm:$0xff]  ;;  %v1019_v44 = vld [vmem:[#allocation4 + $0x168] sm:$0xff]   ;;  %v1023_v48 = vld [vmem:[#allocation4 + $0x158] sm:$0xff]  }
  0x50   : > { %869 = vmatpush3.bf16.msra.mxu0 %v996_v13  ;;  %v211_v41 = vpack.c.bf16 %v205_v40, %v205_v40  ;;  %v1018_v43 = vld [vmem:[#allocation4 + $0x130] sm:$0xff]   ;;  %v1020_v45 = vld [vmem:[#allocation4 + $0x128] sm:$0xff]   ;;  %v1021_v46 = vld [vmem:[#allocation4 + $0x160] sm:$0xff]  }
  0x51   : > { %870 = vmatprep.subr.bf16.mxu0 %v999_v16  ;;  %638 = vmatprep.mubr.bf16.mxu0 %v210_v32  ;;  %v1022_v47 = vld [vmem:[#allocation4 + $0x120] sm:$0xff]   ;;  %v1024_v49 = vld [vmem:[#allocation4 + $0x118] sm:$0xff]   ;;  %v1025_v50 = vld [vmem:[#allocation4 + $0x150] sm:$0xff]  }
  0x52   : > { %891 = vmatpush3.bf16.msra.mxu1 %v998_v15  ;;  %678 = vmatprep.mubr.bf16.mxu1 %v212_v38  ;;  %v208_v51 = vld [vmem:[%s1240_s8 + $0x28] sm:$0xff]  ;;  %v1026_v53 = vld [vmem:[#allocation4 + $0x110] sm:$0xff]   ;;  %v1029_v56 = vld [vmem:[#allocation4 + $0x140] sm:$0xff]  }
  0x53   : > { %892 = vmatprep.subr.bf16.mxu1 %v1001_v18  ;;  %v214_v52 = vpack.c.bf16 %v208_v51, %v208_v51  ;;  %v1027_v54 = vld [vmem:[#allocation4 + $0x148] sm:$0xff]   ;;  %v1030_v57 = vld [vmem:[#allocation4 + $0x100] sm:$0xff]  }
  0x54   : > { %871 = vmatpush3.bf16.msra.mxu0 %v1000_v17  ;;  %v1028_v55 = vld [vmem:[#allocation4 + $0x108] sm:$0xff]   ;;  %v207_v58 = vld [vmem:[%s1240_s8 + $0x20] sm:$0xff] }
  0x55   : > { %872 = vmatprep.subr.bf16.mxu0 %v1003_v20  ;;  %v213_v59 = vpack.c.bf16 %v207_v58, %v207_v58  ;;  %v811_v5 = vld [vmem:[%s1279_s2] ss:$0 sm:$0xff] }
  0x56   : > { %893 = vmatpush3.bf16.msra.mxu1 %v1002_v19 }
  0x57   : > { %894 = vmatprep.subr.bf16.mxu1 %v1005_v22 }
  0x58   : > { %873 = vmatpush3.bf16.msra.mxu0 %v1004_v21 }
  0x59   : > { %874 = vmatprep.subr.bf16.mxu0 %v1007_v24 }
  0x5a   : > { %895 = vmatpush3.bf16.msra.mxu1 %v1006_v23 }
  0x5b   : > { %896 = vmatprep.subr.bf16.mxu1 %v1009_v26 }
  0x5c   : > { %875 = vmatpush3.bf16.msra.mxu0 %v1008_v25 }
  0x5d   : > { %876 = vmatprep.subr.bf16.mxu0 %v1011_v28 }
  0x5e   : > { %897 = vmatpush3.bf16.msra.mxu1 %v1010_v27 }
  0x5f   : > { %898 = vmatprep.subr.bf16.mxu1 %v1013_v30 }
  0x60   : > { %877 = vmatpush3.bf16.msra.mxu0 %v1012_v29 }
  0x61   : > { %906 = vmatprep.subr.bf16.mxu0 %v1015_v36 }
  0x62   : > { %899 = vmatpush3.bf16.msra.mxu1 %v1014_v33 }
  0x63   : > { %639 = vmatmul.mubr.bf16.vlgmr.msra.gmra.mxu0 %v209_v35 }
  0x64   : > { %907 = vmatpush3.bf16.msra.mxu0 %v1016_v39  ;;  %718 = vmatprep.mubr.bf16.mxu0 %v214_v52 }
  0x65   : > { %679 = vmatmul.mubr.bf16.vlgmr.msra.gmra.mxu1 %v211_v41  ;;  %908 = vmatprep.subr.bf16.mxu0 %v1017_v42 }
  0x68   : > { %909 = vmatpush3.bf16.msra.mxu0 %v1018_v43 }
  0x69   : > { %910 = vmatprep.subr.bf16.mxu0 %v1019_v44 }
  0x6c   : > { %911 = vmatpush3.bf16.msra.mxu0 %v1020_v45 }
  0x6d   : > { %912 = vmatprep.subr.bf16.mxu0 %v1021_v46 }
  0x70   : > { %913 = vmatpush3.bf16.msra.mxu0 %v1022_v47 }
  0x71   : > { %914 = vmatprep.subr.bf16.mxu0 %v1023_v48 }
  0x74   : > { %915 = vmatpush3.bf16.msra.mxu0 %v1024_v49 }
  0x75   : > { %916 = vmatprep.subr.bf16.mxu0 %v1025_v50 }
  0x78   : > { %917 = vmatpush3.bf16.msra.mxu0 %v1026_v53 }
  0x79   : > { %918 = vmatprep.subr.bf16.mxu0 %v1027_v54 }
  0x7c   : > { %919 = vmatpush3.bf16.msra.mxu0 %v1028_v55 }
  0x7d   : > { %920 = vmatprep.subr.bf16.mxu0 %v1029_v56 }
  0x80   : > { %921 = vmatpush3.bf16.msra.mxu0 %v1030_v57 }
  0x83   : > { %719 = vmatmul.mubr.bf16.vlgmr.msra.gmra.mxu0 %v213_v59 }
 0x123   : > { %v878_v60 = vpop.f32.mrf.mxu0 }
 0x125   : > { %v879_v61 = vpop.f32.mrf.mxu0  ;;  %v900_v62 = vpop.f32.mrf.mxu1 }
 0x126   : > { %v880_v4 = vadd.f32 %v879_v61, %v878_v60 }
 0x127   : > { %v881_v63 = vpop.f32.mrf.mxu0  ;;  %v901_v0 = vpop.f32.mrf.mxu1 }
 0x128   : > { %v641_v6 = vadd.f32 %v880_v4, %v811_v5  ;;  %v902_v7 = vadd.f32 %v901_v0, %v900_v62 }
 0x129   : > { %v882_v1 = vpop.f32.mrf.mxu0  ;;  %v903_v2 = vpop.f32.mrf.mxu1 }
 0x12a   : > { %v681_v10 = vadd.f32 %v902_v7, %v641_v6 }
 0x12b   : > { %v904_v3 = vpop.f32.mrf.mxu1 }
 0x143   : > { %v922_v8 = vpop.f32.mrf.mxu0 }
 0x145   : > { %v923_v9 = vpop.f32.mrf.mxu0 }
 0x146   : > { %v924_v11 = vadd.f32 %v923_v9, %v922_v8 }
 0x147   : > { %v925_v12 = vpop.f32.mrf.mxu0 }
 0x148   : > { %v721_v13 = vadd.f32 %v924_v11, %v681_v10 }
 0x149   : > { %v926_v14 = vpop.f32.mrf.mxu0 }
 0x14a   : > { %727 = vst.msk [vmem:[%s201_s11] sm:$0xff] %vm726_vm0, %v721_v13 }
 0x14b PF: > { %p14_p11 = scmp.ge.s32.totalorder %s1193_s22, 4   ;;  %s1292_s12 = smov %s1115_s13 }
 0x14c   : > { %s1293_s13 = smov %s1119_s14  ;;  %s1294_s14 = smov %s1210_s30 }
 0x14d   : > { %s1295_s15 = smov %s1193_s22  ;;  %16 = sbr.rel (!%p14_p11) target bundleno = 4 (0x4), region = 76 }
 0x152   :  { %747 = vsyncpa [#allocation3], 1 }
 0x153   :  { %749 = vsyncpa [#allocation3 + $0x1], 1 }
 0x154   :  { %750 = vsyncpa [#allocation5], 1 }

</bundles_post_ra>
